<compile_context>
chip_gen: v5e
topology: v5e:2x2
jax: 0.10.0
libtpu: 0.0.40
codegen_flags: <defaults>
</compile_context>

<pallas_src>
import jax
import jax.numpy as jnp
from jax.experimental import pallas as pl
from jax.experimental.pallas import tpu as pltpu


def capsule_kernel(x_ref, mask_ref, w_att_ref, w_prob_t_ref, b_prob_ref,
                   w_rsi_t_ref, b_rsi_ref,
                   prob_ref, rsi_ref, attn_ref):
    x = x_ref[...]                                  # (TB, T, D)
    mask = mask_ref[...]                            # (TB, T)  0/1 float
    w_att = w_att_ref[...]                          # (1, D)

    # ---- Attention pooling (torchMoji-style attention used by pykt) ----
    # logits = x @ attention_vector  -> (TB, T)
    logits = jnp.sum(x * w_att[None, :, :], axis=-1)
    # exp(logits - max) * mask, then normalize over T.  Per-row max is
    # mathematically identical to the global max used by the reference
    # (the constant cancels in the normalization).
    m = jnp.max(logits, axis=-1, keepdims=True)
    unnorm = jnp.exp(logits - m) * mask
    # eps guards fully-masked (or zero-padded) rows against a 0 denominator.
    denom = jnp.sum(unnorm, axis=-1, keepdims=True) + 1e-9
    inv = pl.reciprocal(denom, approx=False)
    attn = unnorm * inv                             # (TB, T)
    attn_ref[...] = attn

    # weighted sum over the sequence -> capsule vector v_ci (TB, D)
    v_ci = jnp.sum(x * attn[:, :, None], axis=1)

    # ---- prob = sigmoid(linear_prob(dropout(v_ci))) ----
    # final_dropout is identity at eval time.
    prob = jax.nn.sigmoid(
        jnp.dot(v_ci, w_prob_t_ref[...], preferred_element_type=jnp.float32)
        + b_prob_ref[...]
    )                                               # (TB, C)
    prob_ref[...] = prob

    # ---- r_si = linear_r_si(dropout(prob)) * v_ci ----
    rsi_ref[...] = (
        jnp.dot(prob, w_rsi_t_ref[...], preferred_element_type=jnp.float32)
        + b_rsi_ref[...]
    ) * v_ci                                        # (TB, D)


def _round_up(n, m):
    return ((n + m - 1) // m) * m


def capsule_forward(x, mask, params, *, block_b=1024):
    """x: (B, T, D) float32, mask: (B, T) float32 in {0,1}."""
    B, T, D = x.shape
    C = params["w_prob"].shape[0]                   # num_c

    # Batch tile: multiple of 8 (sublane-dense stores), capped at block_b.
    # At T=8, D=32 a 1024-row tile is ~1 MiB of f32 x per buffer, well within
    # the v7x 64 MiB VMEM budget even double-buffered.
    TB = min(block_b, _round_up(B, 8))
    B_pad = _round_up(B, TB)
    if B_pad != B:
        # zero-pad: padded rows have mask==0 -> attn==0, v_ci==0; sliced off below.
        x = jnp.pad(x, ((0, B_pad - B), (0, 0), (0, 0)))
        mask = jnp.pad(mask, ((0, B_pad - B), (0, 0)))

    # pre-transpose Linear weights (PyTorch stores (out, in)) so the kernel
    # does plain row-major matmuls on the MXU.
    w_att2d = params["att_vec"].reshape(1, D)
    w_prob_t = params["w_prob"].T                   # (D, C)
    b_prob2d = params["b_prob"].reshape(1, C)
    w_rsi_t = params["w_rsi"].T                     # (C, D)
    b_rsi2d = params["b_rsi"].reshape(1, D)

    grid = (B_pad // TB,)
    out_shapes = (
        jax.ShapeDtypeStruct((B_pad, C), jnp.float32),  # prob
        jax.ShapeDtypeStruct((B_pad, D), jnp.float32),  # r_si
        jax.ShapeDtypeStruct((B_pad, T), jnp.float32),  # attention
    )
    in_specs = [
        # batch-tiled activations / mask
        pl.BlockSpec((TB, T, D), lambda i: (i, 0, 0)),
        pl.BlockSpec((TB, T), lambda i: (i, 0)),
        # weights/biases stay resident (constant index_map)
        pl.BlockSpec((1, D), lambda i: (0, 0)),
        pl.BlockSpec((D, C), lambda i: (0, 0)),
        pl.BlockSpec((1, C), lambda i: (0, 0)),
        pl.BlockSpec((C, D), lambda i: (0, 0)),
        pl.BlockSpec((1, D), lambda i: (0, 0)),
    ]
    out_specs = (
        pl.BlockSpec((TB, C), lambda i: (i, 0)),
        pl.BlockSpec((TB, D), lambda i: (i, 0)),
        pl.BlockSpec((TB, T), lambda i: (i, 0)),
    )
    prob, r_si, attn = pl.pallas_call(
        capsule_kernel,
        out_shape=out_shapes,
        grid=grid,
        in_specs=in_specs,
        out_specs=out_specs,
        compiler_params=pltpu.CompilerParams(
            dimension_semantics=("parallel",)),     # batch tiles are independent
    )(x, mask, w_att2d, w_prob_t, b_prob2d, w_rsi_t, b_rsi2d)

    if B_pad != B:
        prob, r_si, attn = prob[:B], r_si[:B], attn[:B]
    return prob, r_si, attn


def capsule_reference(x, mask, params):
    """Pure-JAX reference of the PyTorch forward (eval mode)."""
    logits = jnp.einsum("btd,d->bt", x, params["att_vec"])
    m = jnp.max(logits, axis=-1, keepdims=True)
    unnorm = jnp.exp(logits - m) * mask
    attn = unnorm / jnp.sum(unnorm, axis=-1, keepdims=True)
    v_ci = jnp.einsum("btd,bt->bd", x, attn)
    prob = jax.nn.sigmoid(v_ci @ params["w_prob"].T + params["b_prob"])
    r_si = (prob @ params["w_rsi"].T + params["b_rsi"]) * v_ci
    return prob, r_si, attn


if __name__ == "__main__":
    # Small shapes consistent with the module: dim_vector=32, num_c=16
    B, T, D, C = 2, 8, 32, 16

    key = jax.random.PRNGKey(0)
    kx, katt, kwp, kbp, kwr, kbr = jax.random.split(key, 6)

    x = jax.random.normal(kx, (B, T, D), dtype=jnp.float32)
    # mask: valid lengths 6 and 8 out of T=8
    lengths = jnp.array([6, 8], dtype=jnp.int32)
    mask = (jnp.arange(T)[None, :] < lengths[:, None]).astype(jnp.float32)

    params = {
        # Attention.attention_vector ~ N(0, 0.05)
        "att_vec": 0.05 * jax.random.normal(katt, (D,), dtype=jnp.float32),
        # nn.Linear(dim_vector, num_c): weight (num_c, dim_vector), bias (num_c,)
        "w_prob": 0.1 * jax.random.normal(kwp, (C, D), dtype=jnp.float32),
        "b_prob": 0.1 * jax.random.normal(kbp, (C,), dtype=jnp.float32),
        # nn.Linear(num_c, dim_vector): weight (dim_vector, num_c), bias (dim_vector,)
        "w_rsi": 0.1 * jax.random.normal(kwr, (D, C), dtype=jnp.float32),
        "b_rsi": 0.1 * jax.random.normal(kbr, (D,), dtype=jnp.float32),
    }
    # TODO(synk): nn.Dropout is stochastic only in training mode; eval-mode
    # (identity) semantics are implemented here.

    prob, r_si, attn = jax.block_until_ready(capsule_forward(x, mask, params))
    prob_ref, r_si_ref, attn_ref = capsule_reference(x, mask, params)

    assert jnp.allclose(prob, prob_ref, atol=1e-5, rtol=1e-5)
    assert jnp.allclose(r_si, r_si_ref, atol=1e-5, rtol=1e-5)
    assert jnp.allclose(attn, attn_ref, atol=1e-5, rtol=1e-5)
    assert prob.shape == (B, C) and r_si.shape == (B, D) and attn.shape == (B, T)

    print("KERNEL_OK")
</pallas_src>

<mosaic_0001>
module attributes {stable_mosaic.version = 11 : i64} {
  func.func @capsule_kernel(%arg0: i32, %arg1: memref<8x8x32xf32, #tpu.memory_space<vmem>>, %arg2: memref<8x8xf32, #tpu.memory_space<vmem>>, %arg3: memref<1x32xf32, #tpu.memory_space<vmem>>, %arg4: memref<32x16xf32, #tpu.memory_space<vmem>>, %arg5: memref<1x16xf32, #tpu.memory_space<vmem>>, %arg6: memref<16x32xf32, #tpu.memory_space<vmem>>, %arg7: memref<1x32xf32, #tpu.memory_space<vmem>>, %arg8: memref<8x16xf32, #tpu.memory_space<vmem>>, %arg9: memref<8x32xf32, #tpu.memory_space<vmem>>, %arg10: memref<8x8xf32, #tpu.memory_space<vmem>>) attributes {dimension_semantics = [#tpu.dimension_semantics<parallel>], iteration_bounds = array<i64: 1>, scalar_prefetch = 0 : i64, scratch_operands = 0 : i64, tpu.core_type = #tpu.core_type<tc>, window_params = [{transform_indices = @transform_0, window_bounds = array<i64: 8, 8, 32>}, {transform_indices = @transform_1, window_bounds = array<i64: 8, 8>}, {pipeline_mode = #tpu.pipeline_mode<synchronous>, transform_indices = @transform_2, window_bounds = array<i64: 1, 32>}, {pipeline_mode = #tpu.pipeline_mode<synchronous>, transform_indices = @transform_3, window_bounds = array<i64: 32, 16>}, {pipeline_mode = #tpu.pipeline_mode<synchronous>, transform_indices = @transform_4, window_bounds = array<i64: 1, 16>}, {pipeline_mode = #tpu.pipeline_mode<synchronous>, transform_indices = @transform_5, window_bounds = array<i64: 16, 32>}, {pipeline_mode = #tpu.pipeline_mode<synchronous>, transform_indices = @transform_6, window_bounds = array<i64: 1, 32>}, {transform_indices = @transform_7, window_bounds = array<i64: 8, 16>}, {transform_indices = @transform_8, window_bounds = array<i64: 8, 32>}, {transform_indices = @transform_9, window_bounds = array<i64: 8, 8>}]} {
    %c0 = arith.constant 0 : index
    %c0_0 = arith.constant 0 : index
    %c0_1 = arith.constant 0 : index
    %0 = vector.load %arg1[%c0, %c0_0, %c0_1] : memref<8x8x32xf32, #tpu.memory_space<vmem>>, vector<8x8x32xf32>
    %c0_2 = arith.constant 0 : index
    %c0_3 = arith.constant 0 : index
    %1 = vector.load %arg2[%c0_2, %c0_3] : memref<8x8xf32, #tpu.memory_space<vmem>>, vector<8x8xf32>
    %c0_4 = arith.constant 0 : index
    %c0_5 = arith.constant 0 : index
    %2 = vector.load %arg3[%c0_4, %c0_5] : memref<1x32xf32, #tpu.memory_space<vmem>>, vector<1x32xf32>
    %3 = vector.shape_cast %2 : vector<1x32xf32> to vector<1x1x32xf32>
    %4 = vector.broadcast %3 : vector<1x1x32xf32> to vector<8x8x32xf32>
    %5 = arith.mulf %0, %4 : vector<8x8x32xf32>
    %cst = arith.constant dense<0.000000e+00> : vector<8x8xf32>
    %6 = vector.multi_reduction <add>, %5, %cst [2] : vector<8x8x32xf32> to vector<8x8xf32>
    %cst_6 = arith.constant dense<0xFF800000> : vector<8xf32>
    %7 = vector.multi_reduction <maximumf>, %6, %cst_6 [1] : vector<8x8xf32> to vector<8xf32>
    %8 = vector.shape_cast %7 : vector<8xf32> to vector<8x1xf32>
    %9 = vector.broadcast %8 : vector<8x1xf32> to vector<8x8xf32>
    %10 = arith.subf %6, %9 : vector<8x8xf32>
    %11 = math.exp %10 : vector<8x8xf32>
    %12 = arith.mulf %11, %1 : vector<8x8xf32>
    %cst_7 = arith.constant dense<0.000000e+00> : vector<8xf32>
    %13 = vector.multi_reduction <add>, %12, %cst_7 [1] : vector<8x8xf32> to vector<8xf32>
    %14 = vector.shape_cast %13 : vector<8xf32> to vector<8x1xf32>
    %cst_8 = arith.constant 9.99999971E-10 : f32
    %15 = vector.broadcast %cst_8 : f32 to vector<8x1xf32>
    %16 = arith.addf %14, %15 : vector<8x1xf32>
    %17 = tpu.reciprocal %16 : vector<8x1xf32> -> vector<8x1xf32>
    %18 = vector.broadcast %17 : vector<8x1xf32> to vector<8x8xf32>
    %19 = arith.mulf %12, %18 : vector<8x8xf32>
    %c0_9 = arith.constant 0 : index
    %c0_10 = arith.constant 0 : index
    %20 = vector.load %arg10[%c0_9, %c0_10] : memref<8x8xf32, #tpu.memory_space<vmem>>, vector<8x8xf32>
    tpu.vector_store %arg10[%c0_9, %c0_10], %19 {strides = array<i32>} : memref<8x8xf32, #tpu.memory_space<vmem>>, vector<8x8xf32>,
    %21 = vector.shape_cast %19 : vector<8x8xf32> to vector<8x8x1xf32>
    %22 = vector.broadcast %21 : vector<8x8x1xf32> to vector<8x8x32xf32>
    %23 = arith.mulf %0, %22 : vector<8x8x32xf32>
    %cst_11 = arith.constant dense<0.000000e+00> : vector<8x32xf32>
    %24 = vector.multi_reduction <add>, %23, %cst_11 [1] : vector<8x8x32xf32> to vector<8x32xf32>
    %c0_12 = arith.constant 0 : index
    %c0_13 = arith.constant 0 : index
    %25 = vector.load %arg4[%c0_12, %c0_13] : memref<32x16xf32, #tpu.memory_space<vmem>>, vector<32x16xf32>
    %cst_14 = arith.constant dense<0.000000e+00> : vector<8x16xf32>
    %26 = tpu.matmul %24, %25, %cst_14 {dimension_numbers = #tpu.dot_dimension_numbers<[1], [0], [0], [1], [0, 0, 1, 1], [], []>} : vector<8x32xf32>, vector<32x16xf32>, vector<8x16xf32> -> vector<8x16xf32>
    %c0_15 = arith.constant 0 : index
    %c0_16 = arith.constant 0 : index
    %27 = vector.load %arg5[%c0_15, %c0_16] : memref<1x16xf32, #tpu.memory_space<vmem>>, vector<1x16xf32>
    %28 = vector.broadcast %27 : vector<1x16xf32> to vector<8x16xf32>
    %29 = arith.addf %26, %28 : vector<8x16xf32>
    %30 = arith.negf %29 : vector<8x16xf32>
    %31 = math.exp %30 : vector<8x16xf32>
    %cst_17 = arith.constant 1.000000e+00 : f32
    %32 = vector.broadcast %cst_17 : f32 to vector<8x16xf32>
    %33 = arith.addf %32, %31 : vector<8x16xf32>
    %34 = arith.divf %32, %33 : vector<8x16xf32>
    %c0_18 = arith.constant 0 : index
    %c0_19 = arith.constant 0 : index
    %35 = vector.load %arg8[%c0_18, %c0_19] : memref<8x16xf32, #tpu.memory_space<vmem>>, vector<8x16xf32>
    tpu.vector_store %arg8[%c0_18, %c0_19], %34 {strides = array<i32>} : memref<8x16xf32, #tpu.memory_space<vmem>>, vector<8x16xf32>,
    %c0_20 = arith.constant 0 : index
    %c0_21 = arith.constant 0 : index
    %36 = vector.load %arg6[%c0_20, %c0_21] : memref<16x32xf32, #tpu.memory_space<vmem>>, vector<16x32xf32>
    %cst_22 = arith.constant dense<0.000000e+00> : vector<8x32xf32>
    %37 = tpu.matmul %34, %36, %cst_22 {dimension_numbers = #tpu.dot_dimension_numbers<[1], [0], [0], [1], [0, 0, 1, 1], [], []>} : vector<8x16xf32>, vector<16x32xf32>, vector<8x32xf32> -> vector<8x32xf32>
    %c0_23 = arith.constant 0 : index
    %c0_24 = arith.constant 0 : index
    %38 = vector.load %arg7[%c0_23, %c0_24] : memref<1x32xf32, #tpu.memory_space<vmem>>, vector<1x32xf32>
    %39 = vector.broadcast %38 : vector<1x32xf32> to vector<8x32xf32>
    %40 = arith.addf %37, %39 : vector<8x32xf32>
    %41 = arith.mulf %40, %24 : vector<8x32xf32>
    %c0_25 = arith.constant 0 : index
    %c0_26 = arith.constant 0 : index
    %42 = vector.load %arg9[%c0_25, %c0_26] : memref<8x32xf32, #tpu.memory_space<vmem>>, vector<8x32xf32>
    tpu.vector_store %arg9[%c0_25, %c0_26], %41 {strides = array<i32>} : memref<8x32xf32, #tpu.memory_space<vmem>>, vector<8x32xf32>,
    return
  }
  func.func @transform_0(%arg0: i32) -> (i32, i32, i32) {
    %c0_i32 = arith.constant 0 : i32
    %c0_i32_0 = arith.constant 0 : i32
    %c0_i32_1 = arith.constant 0 : i32
    return %arg0, %c0_i32, %c0_i32_0 : i32, i32, i32
  }
  func.func @transform_1(%arg0: i32) -> (i32, i32) {
    %c0_i32 = arith.constant 0 : i32
    %c0_i32_0 = arith.constant 0 : i32
    return %arg0, %c0_i32 : i32, i32
  }
  func.func @transform_2(%arg0: i32) -> (i32, i32) {
    %c0_i32 = arith.constant 0 : i32
    %c0_i32_0 = arith.constant 0 : i32
    %c0_i32_1 = arith.constant 0 : i32
    return %c0_i32, %c0_i32_0 : i32, i32
  }
  func.func @transform_3(%arg0: i32) -> (i32, i32) {
    %c0_i32 = arith.constant 0 : i32
    %c0_i32_0 = arith.constant 0 : i32
    %c0_i32_1 = arith.constant 0 : i32
    return %c0_i32, %c0_i32_0 : i32, i32
  }
  func.func @transform_4(%arg0: i32) -> (i32, i32) {
    %c0_i32 = arith.constant 0 : i32
    %c0_i32_0 = arith.constant 0 : i32
    %c0_i32_1 = arith.constant 0 : i32
    return %c0_i32, %c0_i32_0 : i32, i32
  }
  func.func @transform_5(%arg0: i32) -> (i32, i32) {
    %c0_i32 = arith.constant 0 : i32
    %c0_i32_0 = arith.constant 0 : i32
    %c0_i32_1 = arith.constant 0 : i32
    return %c0_i32, %c0_i32_0 : i32, i32
  }
  func.func @transform_6(%arg0: i32) -> (i32, i32) {
    %c0_i32 = arith.constant 0 : i32
    %c0_i32_0 = arith.constant 0 : i32
    %c0_i32_1 = arith.constant 0 : i32
    return %c0_i32, %c0_i32_0 : i32, i32
  }
  func.func @transform_7(%arg0: i32) -> (i32, i32) {
    %c0_i32 = arith.constant 0 : i32
    %c0_i32_0 = arith.constant 0 : i32
    return %arg0, %c0_i32 : i32, i32
  }
  func.func @transform_8(%arg0: i32) -> (i32, i32) {
    %c0_i32 = arith.constant 0 : i32
    %c0_i32_0 = arith.constant 0 : i32
    return %arg0, %c0_i32 : i32, i32
  }
  func.func @transform_9(%arg0: i32) -> (i32, i32) {
    %c0_i32 = arith.constant 0 : i32
    %c0_i32_0 = arith.constant 0 : i32
    return %arg0, %c0_i32 : i32, i32
  }
}

</mosaic_0001>

<bundles_post_ra>
// kernel: tpu_custom_call.1
= control target key start
LH: loop header
LB: loop body
LE: loop exit
PB: predicated region body
PF: predicated region fallthrough
CT: control target
= control target key end

     0   :  { %15 = vsyncpa [#allocation3], 0  ;;  %s979_s0 = inlined_call_operand.hbm [shape: f32[8,8,32], index: 0, kind: input, shape index: {}]   ;;  %s980_s1 = inlined_call_operand.vmem [shape: f32[8,8], index: 1, kind: input, shape index: {}]   ;;  %s981_s2 = inlined_call_operand.vmem [shape: f32[1,32], index: 2, kind: input, shape index: {}]   ;;  %s982_s3 = inlined_call_operand.vmem [shape: f32[32,16], index: 3, kind: input, shape index: {}]   ;;  %s983_s4 = inlined_call_operand.vmem [shape: f32[1,16], index: 4, kind: input, shape index: {}]   ;;  %s984_s5 = inlined_call_operand.vmem [shape: f32[16,32], index: 5, kind: input, shape index: {}]   ;;  %s985_s6 = inlined_call_operand.vmem [shape: f32[1,32], index: 6, kind: input, shape index: {}]   ;;  %s986_s7 = inlined_call_operand.hbm [shape: f32[8,16], index: 7, kind: output, shape index: {0}]   ;;  %s987_s8 = inlined_call_operand.hbm [shape: f32[8,32], index: 8, kind: output, shape index: {1}]   ;;  %s988_s9 = inlined_call_operand.hbm [shape: f32[8,8], index: 9, kind: output, shape index: {2}]  }
   0x1   :  { %16 = vsyncpa [#allocation4], 0 }
   0x2   :  { %17 = vsyncpa [#allocation7], 0  ;;  %s22_s11 = sshll.u32 %s979_s0, 4  ;;  %s745_s12 = smov [#allocation2]   ;;  %s23_s11 = int_to_ptr.hbm [resolvable:$true] %s22_s11 }
   0x3   :  { %s24_s13 = sshll.u32 %s745_s12, 4  ;;  %s746_s14 = smov 128   ;;  %s25_s13 = int_to_ptr.vmem [resolvable:$true] %s24_s13 }
   0x4   :  { %s747_s15 = smov 8  }
   0x5   :  { %30 = dma.hbm_to_vmem [thread:$0]  %s23_s11, 1024, %s25_s13, [#allocation3], %s746_s14, %s746_s14, %s747_s15  }
   0x6   :  { %739 = dma.done.wait [#allocation3], 1024  }
   0x7   :  { %740 = vsyncadd [#allocation3], 4294966272  ;;  %v101_v0 = vlaneseq  ;;  %v805_v2 = vld [vmem:[#allocation2] sm:$0xff]  ;;  %vm68_vm0 = vcmask 261120   ;;  %v810_v4 = vld [vmem:[#allocation2 + $0x10] sm:$0xff]  ;;  %vm111_vm1 = vcmask 1041409  }
   0x8   :  { %v618_v3 = vld [vmem:[%s981_s2] ss:$0 sm:$0xff]  ;;  %v817_v9 = vld [vmem:[#allocation2 + $0x8] sm:$0xff]  ;;  %v819_v10 = vld [vmem:[#allocation2 + $0x18] sm:$0xff]  ;;  %vm113_vm2 = vcmask 1042434   ;;  %vm115_vm3 = vcmask 1043459  }
   0x9   :  { %v174_v1 = vshrl.u32 %v101_v0, 7  ;;  %v812_v5 = vld [vmem:[#allocation2 + $0x20] sm:$0xff]  ;;  %v60_v6 = vmul.f32 %v618_v3, %v805_v2  ;;  %v62_v7 = vmul.f32 %v618_v3, %v810_v4  ;;  %v824_v14 = vld [vmem:[#allocation2 + $0x28] sm:$0xff]  ;;  %v61_v15 = vmul.f32 %v618_v3, %v817_v9  ;;  %v832_v21 = vld [vmem:[#allocation2 + $0x30] sm:$0xff]  ;;  %s561_s30 = sshll.u32 %s986_s7, 4  ;;  %s749_s10 = smov [#allocation5]   ;;  %s562_s30 = int_to_ptr.hbm [resolvable:$true] %s561_s30 }
   0xa   :  { %v64_v8 = vmul.f32 %v618_v3, %v812_v5  ;;  %v63_v16 = vmul.f32 %v618_v3, %v819_v10  ;;  %v65_v17 = vmul.f32 %v618_v3, %v824_v14  ;;  %v834_v22 = vld [vmem:[#allocation2 + $0x38] sm:$0xff]  ;;  %v66_v23 = vmul.f32 %v618_v3, %v832_v21  ;;  %v55_v27 = vld [vmem:[%s980_s1] sm:$0xff]  ;;  %s559_s11 = sshll.u32 %s749_s10, 4  ;;  %s750_s14 = smov [#allocation6]   ;;  %s560_s11 = int_to_ptr.vmem [resolvable:$true] %s559_s11 }
   0xb   :  { %614 = vset.pattern.permute.xlu2 %v174_v1  ;;  %613 = vset.pattern.permute.xlu1 %v174_v1  ;;  %v69_v11 = vsel %vm68_vm0, %v60_v6, 0.0  ;;  %v75_v12 = vsel %vm68_vm0, %v62_v7, 0.0  ;;  %v72_v18 = vsel %vm68_vm0, %v61_v15, 0.0  ;;  %v67_v24 = vmul.f32 %v618_v3, %v834_v22  ;;  %s570_s15 = sshll.u32 %s750_s14, 4  ;;  %s572_s0 = sshll.u32 %s987_s8, 4  ;;  %s571_s15 = int_to_ptr.vmem [resolvable:$true] %s570_s15  ;;  %s573_s0 = int_to_ptr.hbm [resolvable:$true] %s572_s0 }
   0xc   :  { %612 = vset.pattern.permute.xlu0 %v174_v1  ;;  %v81_v13 = vsel %vm68_vm0, %v64_v8, 0.0  ;;  %76 = vadd.xlane.f32.xlu1 %v75_v12  ;;  %v78_v19 = vsel %vm68_vm0, %v63_v16, 0.0  ;;  %v84_v20 = vsel %vm68_vm0, %v65_v17, 0.0  ;;  %v87_v25 = vsel %vm68_vm0, %v66_v23, 0.0  ;;  %s751_s2 = smov [#allocation8]   ;;  %s583_s19 = sshll.u32 %s988_s9, 4  ;;  %s584_s19 = int_to_ptr.hbm [resolvable:$true] %s583_s19 }
   0xd   :  { %70 = vadd.xlane.f32.xlu0 %v69_v11  ;;  %82 = vadd.xlane.f32.xlu2 %v81_v13  ;;  %v90_v26 = vsel %vm68_vm0, %v67_v24, 0.0  ;;  %v186_v28 = vperm.slane %v55_v27, 2  ;;  %v193_v29 = vperm.slane %v55_v27, 3  ;;  %v179_v30 = vperm.slane %v55_v27, 1  ;;  %s581_s1 = sshll.u32 %s751_s2, 4  ;;  %s582_s1 = int_to_ptr.vmem [resolvable:$true] %s581_s1 }
   0xe   :  { %v172_v31 = vperm.slane %v55_v27, 0  ;;  %v200_v32 = vperm.slane %v55_v27, 4  ;;  %v221_v33 = vperm.slane %v55_v27, 7  ;;  %v214_v34 = vperm.slane %v55_v27, 6 }
   0xf   :  { %v843_v38 = vand.u32 127, %v101_v0  ;;  %vm117_vm4 = vcmask 1044484   ;;  %vm119_vm5 = vcmask 1045509   ;;  %vm121_vm6 = vcmask 1046534  }
  0x10   :  { %vm123_vm7 = vcmask 1047559   ;;  %vm126_vm8 = vcmask 64512   ;;  %v207_v60 = vperm.slane %v55_v27, 5  ;;  %v748_v62 = vmov 0  }
  0x14   :  { %79 = vadd.xlane.f32.xlu1 %v78_v19 }
  0x15   :  { %73 = vadd.xlane.f32.xlu0 %v72_v18  ;;  %85 = vadd.xlane.f32.xlu2 %v84_v20 }
  0x1c   :  { %91 = vadd.xlane.f32.xlu1 %v90_v26 }
  0x1d   :  { %88 = vadd.xlane.f32.xlu0 %v87_v25 }
  0x2d   :  { %191 = vperm.xlu2 %614, %v186_v28  }
  0x31   :  { %177 = vperm.xlu0 %612, %v172_v31  }
  0x35   :  { %198 = vperm.xlu2 %614, %v193_v29   ;;  %184 = vperm.xlu1 %613, %v179_v30  }
  0x39   :  { %226 = vperm.xlu0 %612, %v221_v33  }
  0x3d   :  { %205 = vperm.xlu1 %613, %v200_v32  }
  0x41   :  { %617 = vset.pattern.permute.xlu0 %v748_v62 }
  0x45   :  { %219 = vperm.xlu1 %613, %v214_v34  }
  0x4d   :  { %616 = vset.pattern.permute.xlu1 %v748_v62 }
  0x7f   :  { %v77_v36 = vpop.xlane.xlu1 %76 }
  0x80   :  { %v71_v35 = vpop.xlane.xlu0 %70  ;;  %v83_v37 = vpop.xlane.xlu2 %82  ;;  %v105_v44 = vperm.slane %v77_v36, %v843_v38 }
  0x81   :  { %v103_v41 = vperm.slane %v71_v35, %v843_v38  ;;  %v107_v48 = vperm.slane %v83_v37, %v843_v38 }
  0x87   :  { %v80_v40 = vpop.xlane.xlu1 %79 }
  0x88   :  { %v74_v39 = vpop.xlane.xlu0 %73  ;;  %v106_v43 = vperm.slane %v80_v40, %v843_v38  ;;  %v86_v46 = vpop.xlane.xlu2 %85 }
  0x89   :  { %v104_v42 = vperm.slane %v74_v39, %v843_v38  ;;  %v108_v50 = vperm.slane %v86_v46, %v843_v38 }
  0x8b   :  { %v112_v45 = vsel %vm111_vm1, %v104_v42, %v103_v41 }
  0x8c   :  { %v114_v47 = vsel %vm113_vm2, %v105_v44, %v112_v45 }
  0x8d   :  { %v116_v49 = vsel %vm115_vm3, %v106_v43, %v114_v47 }
  0x8e   :  { %v118_v51 = vsel %vm117_vm4, %v107_v48, %v116_v49 }
  0x8f   :  { %v92_v53 = vpop.xlane.xlu1 %91  ;;  %v120_v56 = vsel %vm119_vm5, %v108_v50, %v118_v51 }
  0x90   :  { %v89_v52 = vpop.xlane.xlu0 %88  ;;  %v110_v55 = vperm.slane %v92_v53, %v843_v38  ;;  %v192_v61 = vpop.permute.xlu2 %191 }
  0x91   :  { %v109_v54 = vperm.slane %v89_v52, %v843_v38 }
  0x93   :  { %v122_v57 = vsel %vm121_vm6, %v109_v54, %v120_v56 }
  0x94   :  { %v124_v58 = vsel %vm123_vm7, %v110_v55, %v122_v57 }
  0x95   :  { %v127_v59 = vsel %vm126_vm8, %v124_v58, -inf }
  0x96   :  { %128 = vmax.xlane.f32.xlu2 %v127_v59 }
  0x98   :  { %v199_v63 = vpop.permute.xlu2 %198 }
  0xa3   :  { %v178_v28 = vpop.permute.xlu0 %177 }
  0xa7   :  { %v185_v26 = vpop.permute.xlu1 %184 }
  0xae   :  { %212 = vperm.xlu2 %614, %v207_v60  }
  0xaf   :  { %v206_v42 = vpop.permute.xlu1 %205 }
  0xb6   :  { %615 = vset.pattern.permute.xlu2 %v748_v62 }
  0xb7   :  { %v220_v54 = vpop.permute.xlu1 %219 }
 0x109   :  { %v129_v0 = vpop.xlane.xlu2 %128 }
 0x10a   :  { %v131_v1 = vperm.slane %v129_v0, 0  ;;  %v133_v3 = vperm.slane %v129_v0, 2  ;;  %v132_v6 = vperm.slane %v129_v0, 1  ;;  %v134_v7 = vperm.slane %v129_v0, 3 }
 0x10b   :  { %v138_v15 = vperm.slane %v129_v0, 7  ;;  %v135_v17 = vperm.slane %v129_v0, 4  ;;  %v136_v20 = vperm.slane %v129_v0, 5  ;;  %v137_v33 = vperm.slane %v129_v0, 6 }
 0x10c   :  { %v147_v8 = vsub.f32 %v71_v35, %v131_v1  ;;  %v149_v11 = vsub.f32 %v77_v36, %v133_v3  ;;  %v148_v13 = vsub.f32 %v74_v39, %v132_v6  ;;  %v150_v16 = vsub.f32 %v80_v40, %v134_v7 }
 0x10d   :  { %v154_v23 = vsub.f32 %v92_v53, %v138_v15  ;;  %v151_v25 = vsub.f32 %v83_v37, %v135_v17  ;;  %v152_v29 = vsub.f32 %v86_v46, %v136_v20  ;;  %v153_v37 = vsub.f32 %v89_v52, %v137_v33  ;;  %v227_v46 = vpop.permute.xlu0 %226 }
 0x10e   :  { %v155_v12 = vmul.f32 1.442695, %v147_v8  ;;  %v159_v18 = vmul.f32 1.442695, %v149_v11  ;;  %v157_v19 = vmul.f32 1.442695, %v148_v13 }
 0x10f   :  { %v161_v24 = vmul.f32 1.442695, %v150_v16  ;;  %v169_v30 = vmul.f32 1.442695, %v154_v23  ;;  %v163_v31 = vmul.f32 1.442695, %v151_v25 }
 0x110   :  { %621 = vpow2.f32 %v155_v12  ;;  %v165_v35 = vmul.f32 1.442695, %v152_v29  ;;  %v167_v43 = vmul.f32 1.442695, %v153_v37 }
 0x111   :  { %623 = vpow2.f32 %v159_v18  ;;  %v213_v51 = vpop.permute.xlu2 %212 }
 0x112   :  { %625 = vpow2.f32 %v157_v19 }
 0x113   :  { %627 = vpow2.f32 %v161_v24 }
 0x114   :  { %629 = vpow2.f32 %v169_v30 }
 0x115   :  { %631 = vpow2.f32 %v163_v31 }
 0x116   :  { %v622_v27 = vpop.eup %621  ;;  %633 = vpow2.f32 %v165_v35 }
 0x117   :  { %v861_v32 = vmul.f32 %v622_v27, %v178_v28  ;;  %v624_v34 = vpop.eup %623  ;;  %635 = vpow2.f32 %v167_v43 }
 0x118   :  { %v626_v36 = vpop.eup %625  ;;  %v864_v39 = vmul.f32 %v624_v34, %v192_v61 }
 0x119   :  { %253 = vperm.xlu2 %615, %v861_v32   ;;  %v628_v40 = vpop.eup %627  ;;  %v866_v41 = vmul.f32 %v626_v36, %v185_v26 }
 0x11a   :  { %259 = vperm.xlu0 %617, %v864_v39   ;;  %v870_v44 = vmul.f32 %v628_v40, %v199_v63  ;;  %v630_v45 = vpop.eup %629 }
 0x11b   :  { %256 = vperm.xlu1 %616, %v866_v41   ;;  %v632_v47 = vpop.eup %631  ;;  %v873_v48 = vmul.f32 %v630_v45, %v227_v46 }
 0x11c   :  { %v634_v49 = vpop.eup %633  ;;  %v875_v50 = vmul.f32 %v632_v47, %v206_v42 }
 0x11d   :  { %v241_v52 = vmul.f32 %v634_v49, %v213_v51  ;;  %v636_v53 = vpop.eup %635 }
 0x11e   :  { %v879_v55 = vmul.f32 %v636_v53, %v220_v54 }
 0x121   :  { %262 = vperm.xlu2 %615, %v870_v44  }
 0x122   :  { %274 = vperm.xlu0 %617, %v873_v48  }
 0x123   :  { %265 = vperm.xlu1 %616, %v875_v50  }
 0x129   :  { %268 = vperm.xlu2 %615, %v241_v52  }
 0x12b   :  { %271 = vperm.xlu1 %616, %v879_v55  }
 0x173   :  { %v254_v56 = vpop.permute.xlu2 %253 }
 0x174   :  { %v276_v61 = vperm.slane %v254_v56, %v843_v38 }
 0x17b   :  { %v263_v58 = vpop.permute.xlu2 %262 }
 0x17c   :  { %v279_v6 = vperm.slane %v263_v58, %v843_v38 }
 0x183   :  { %v269_v7 = vpop.permute.xlu2 %268 }
 0x184   :  { %v281_v13 = vperm.slane %v269_v7, %v843_v38 }
 0x18c   :  { %v260_v60 = vpop.permute.xlu0 %259 }
 0x18d   :  { %v257_v57 = vpop.permute.xlu1 %256  ;;  %v278_v62 = vperm.slane %v260_v60, %v843_v38 }
 0x18e   :  { %v277_v59 = vperm.slane %v257_v57, %v843_v38 }
 0x190   :  { %v284_v63 = vsel %vm111_vm1, %v277_v59, %v276_v61  ;;  %v459_v61 = vld [vmem:[%s982_s3 + $0x18] sm:$0xff] }
 0x191   :  { %v285_v1 = vsel %vm113_vm2, %v278_v62, %v284_v63  ;;  %493 = vmatpush.msra.mxu0 %v459_v61 }
 0x192   :  { %v286_v8 = vsel %vm115_vm3, %v279_v6, %v285_v1 }
 0x194   :  { %v275_v12 = vpop.permute.xlu0 %274 }
 0x195   :  { %v266_v0 = vpop.permute.xlu1 %265  ;;  %v283_v17 = vperm.slane %v275_v12, %v843_v38 }
 0x196   :  { %v280_v3 = vperm.slane %v266_v0, %v843_v38 }
 0x198   :  { %v287_v11 = vsel %vm117_vm4, %v280_v3, %v286_v8 }
 0x199   :  { %v288_v18 = vsel %vm119_vm5, %v281_v13, %v287_v11 }
 0x19d   :  { %v272_v15 = vpop.permute.xlu1 %271 }
 0x19e   :  { %v282_v16 = vperm.slane %v272_v15, %v843_v38 }
 0x1a0   :  { %v289_v19 = vsel %vm121_vm6, %v282_v16, %v288_v18 }
 0x1a1   :  { %v290_v20 = vsel %vm123_vm7, %v283_v17, %v289_v19 }
 0x1a2   :  { %v292_v23 = vsel %vm126_vm8, %v290_v20, 0.0 }
 0x1a3   :  { %293 = vadd.xlane.f32.xlu2 %v292_v23 }
 0x216   :  { %v294_v24 = vpop.xlane.xlu2 %293 }
 0x217   :  { %v295_v25 = vadd.f32 1e-09, %v294_v24 }
 0x219   :  { %637 = vrcp.f32 %v295_v25  ;;  %v307_v29 = vand.u32 2147483648, %v295_v25  ;;  %v305_v31 = vand.u32 2147483647, %v295_v25  ;;  %vm301_vm10 = vweird.f32 %v295_v25 }
 0x21b   :  { %v308_v34 = vor.u32 1.1754944e-38, %v307_v29  ;;  %vm306_vm12 = vcmp.eq.f32.partialorder %v305_v31, 8.507059e+37 }
 0x21f   :  { %v638_v26 = vpop.eup %637 }
 0x220   :  { %v297_v27 = vmul.f32 %v638_v26, %v295_v25  ;;  %vm302_vm9 = vweird.f32 %v638_v26 }
 0x221   :  { %vm303_vm11 = vmor %vm301_vm10, %vm302_vm9 }
 0x222   :  { %v298_v28 = vsub.f32 1.0, %v297_v27 }
 0x224   :  { %v299_v30 = vmul.f32 %v638_v26, %v298_v28 }
 0x226   :  { %v300_v33 = vadd.f32 %v638_v26, %v299_v30 }
 0x228   :  { %v304_v35 = vsel %vm303_vm11, %v638_v26, %v300_v33 }
 0x229   :  { %v309_v36 = vsel %vm306_vm12, %v308_v34, %v304_v35 }
 0x22a   :  { %v312_v37 = vperm.slane %v309_v36, 1  ;;  %v311_v40 = vperm.slane %v309_v36, 0  ;;  %v314_v45 = vperm.slane %v309_v36, 3  ;;  %v313_v46 = vperm.slane %v309_v36, 2 }
 0x22b   :  { %v316_v51 = vperm.slane %v309_v36, 5  ;;  %v315_v53 = vperm.slane %v309_v36, 4  ;;  %v317_v57 = vperm.slane %v309_v36, 6 }
 0x22c   :  { %v328_v42 = vmul.f32 %v312_v37, %v866_v41  ;;  %v327_v43 = vmul.f32 %v311_v40, %v861_v32  ;;  %v330_v47 = vmul.f32 %v314_v45, %v870_v44  ;;  %v329_v49 = vmul.f32 %v313_v46, %v864_v39 }
 0x22d   :  { %v332_v54 = vmul.f32 %v316_v51, %v241_v52  ;;  %v331_v56 = vmul.f32 %v315_v53, %v875_v50  ;;  %v318_v41 = vperm.slane %v309_v36, 7  ;;  %v333_v58 = vmul.f32 %v317_v57, %v879_v55  ;;  %v458_v55 = vld [vmem:[%s982_s3 + $0x10] sm:$0xff] }
 0x22e   :  { %347 = vperm.xlu0 %617, %v328_v42   ;;  %344 = vperm.xlu1 %616, %v327_v43  }
 0x22f   :  { %v334_v32 = vmul.f32 %v318_v41, %v873_v48  ;;  %494 = vmatpush.msra.mxu0 %v458_v55 }
 0x236   :  { %353 = vperm.xlu0 %617, %v330_v47   ;;  %350 = vperm.xlu1 %616, %v329_v49  }
 0x23e   :  { %359 = vperm.xlu0 %617, %v332_v54   ;;  %356 = vperm.xlu1 %616, %v331_v56  }
 0x246   :  { %365 = vperm.xlu0 %617, %v334_v32   ;;  %362 = vperm.xlu1 %616, %v333_v58  }
 0x2a0   :  { %v348_v44 = vpop.permute.xlu0 %347  ;;  %v345_v59 = vpop.permute.xlu1 %344 }
 0x2a1   :  { %v393_v39 = vmul.f32 %v348_v44, %v817_v9  ;;  %v392_v60 = vmul.f32 %v345_v59, %v805_v2  ;;  %v457_v2 = vld [vmem:[%s982_s3 + $0x8] sm:$0xff]  ;;  %v456_v9 = vld [vmem:[%s982_s3] sm:$0xff]  ;;  %v368_v16 = vperm.slane %v348_v44, %v843_v38  ;;  %v367_v17 = vperm.slane %v345_v59, %v843_v38 }
 0x2a2   :  { %495 = vmatpush.msra.mxu0 %v457_v2 }
 0x2a3   :  { %v407_v52 = vsel %vm68_vm0, %v393_v39, 0.0  ;;  %v400_v50 = vsel %vm68_vm0, %v392_v60, 0.0  ;;  %v375_v28 = vsel %vm111_vm1, %v368_v16, %v367_v17 }
 0x2a4   :  { %v408_v48 = vrot.slane %v407_v52, 4  ;;  %v401_v62 = vrot.slane %v400_v50, 4  ;;  %496 = vmatpush.msra.mxu0 %v456_v9 }
 0x2a6   :  { %v409_v1 = vadd.f32 %v408_v48, %v407_v52  ;;  %v402_v7 = vadd.f32 %v401_v62, %v400_v50 }
 0x2a8   :  { %v354_v63 = vpop.permute.xlu0 %353  ;;  %v351_v0 = vpop.permute.xlu1 %350  ;;  %v410_v15 = vrot.slane %v409_v1, 2  ;;  %v403_v18 = vrot.slane %v402_v7, 2 }
 0x2a9   :  { %v395_v3 = vmul.f32 %v354_v63, %v819_v10  ;;  %v394_v6 = vmul.f32 %v351_v0, %v810_v4  ;;  %v369_v20 = vperm.slane %v351_v0, %v843_v38  ;;  %v370_v30 = vperm.slane %v354_v63, %v843_v38 }
 0x2aa   :  { %v411_v25 = vadd.f32 %v410_v15, %v409_v1  ;;  %v404_v29 = vadd.f32 %v403_v18, %v402_v7 }
 0x2ab   :  { %v421_v8 = vsel %vm68_vm0, %v395_v3, 0.0  ;;  %v414_v11 = vsel %vm68_vm0, %v394_v6, 0.0  ;;  %v376_v31 = vsel %vm113_vm2, %v369_v20, %v375_v28  ;;  %v522_v28 = vld [vmem:[%s984_s5] sm:$0xff] }
 0x2ac   :  { %v422_v12 = vrot.slane %v421_v8, 4  ;;  %v415_v13 = vrot.slane %v414_v11, 4  ;;  %v377_v45 = vsel %vm115_vm3, %v370_v30, %v376_v31  ;;  %v405_v47 = vrot.slane %v404_v29, 1 }
 0x2ae   :  { %v416_v19 = vadd.f32 %v415_v13, %v414_v11  ;;  %v423_v10 = vadd.f32 %v422_v12, %v421_v8  ;;  %v406_v50 = vadd.f32 %v405_v47, %v404_v29  ;;  %v619_v29 = vld [vmem:[%s983_s4] ss:$0 sm:$0xff] }
 0x2b0   :  { %v417_v23 = vrot.slane %v416_v19, 2  ;;  %v360_v4 = vpop.permute.xlu0 %359  ;;  %v357_v24 = vpop.permute.xlu1 %356  ;;  %v424_v36 = vrot.slane %v423_v10, 2 }
 0x2b1   :  { %v397_v26 = vmul.f32 %v360_v4, %v824_v14  ;;  %v396_v27 = vmul.f32 %v357_v24, %v812_v5  ;;  %v371_v34 = vperm.slane %v357_v24, %v843_v38  ;;  %v412_v14 = vrot.slane %v411_v25, 1 }
 0x2b2   :  { %v418_v37 = vadd.f32 %v417_v23, %v416_v19  ;;  %v372_v5 = vperm.slane %v360_v4, %v843_v38  ;;  %v425_v51 = vadd.f32 %v424_v36, %v423_v10 }
 0x2b3   :  { %v435_v33 = vsel %vm68_vm0, %v397_v26, 0.0  ;;  %v428_v35 = vsel %vm68_vm0, %v396_v27, 0.0  ;;  %v378_v49 = vsel %vm117_vm4, %v371_v34, %v377_v45  ;;  %v413_v39 = vadd.f32 %v412_v14, %v411_v25  ;;  %v523_v27 = vld [vmem:[%s984_s5 + $0x8] sm:$0xff] }
 0x2b4   :  { %v436_v40 = vrot.slane %v435_v33, 4  ;;  %v429_v42 = vrot.slane %v428_v35, 4  ;;  %v419_v53 = vrot.slane %v418_v37, 1  ;;  %v379_v52 = vsel %vm119_vm5, %v372_v5, %v378_v49  ;;  %545 = vmatpush.msra.mxu1 %v523_v27  ;;  %v620_v49 = vld [vmem:[%s985_s6] ss:$0 sm:$0xff] }
 0x2b5   :  { %v426_v62 = vrot.slane %v425_v51, 1  ;;  %v472_v3 = vsel %vm111_vm1, %v413_v39, %v406_v50  ;;  %vm520_vm1 = vcmask 130048  }
 0x2b6   :  { %v437_v43 = vadd.f32 %v436_v40, %v435_v33  ;;  %v430_v46 = vadd.f32 %v429_v42, %v428_v35  ;;  %v420_v63 = vadd.f32 %v419_v53, %v418_v37  ;;  %546 = vmatpush.msra.mxu1 %v522_v28 }
 0x2b7   :  { %v427_v6 = vadd.f32 %v426_v62, %v425_v51 }
 0x2b8   :  { %v438_v54 = vrot.slane %v437_v43, 2  ;;  %v431_v56 = vrot.slane %v430_v46, 2  ;;  %v366_v41 = vpop.permute.xlu0 %365  ;;  %v363_v57 = vpop.permute.xlu1 %362  ;;  %v473_v13 = vsel %vm113_vm2, %v420_v63, %v472_v3 }
 0x2b9   :  { %v374_v32 = vperm.slane %v366_v41, %v843_v38  ;;  %v399_v58 = vmul.f32 %v366_v41, %v834_v22  ;;  %v373_v44 = vperm.slane %v363_v57, %v843_v38  ;;  %v398_v59 = vmul.f32 %v363_v57, %v832_v21 }
 0x2ba   :  { %v432_v60 = vadd.f32 %v431_v56, %v430_v46  ;;  %v439_v2 = vadd.f32 %v438_v54, %v437_v43  ;;  %v474_v19 = vsel %vm115_vm3, %v427_v6, %v473_v13 }
 0x2bb   :  { %v449_v61 = vsel %vm68_vm0, %v399_v58, 0.0  ;;  %v380_v48 = vsel %vm121_vm6, %v373_v44, %v379_v52  ;;  %v442_v55 = vsel %vm68_vm0, %v398_v59, 0.0 }
 0x2bc   :  { %v450_v9 = vrot.slane %v449_v61, 4  ;;  %v381_v22 = vsel %vm123_vm7, %v374_v32, %v380_v48  ;;  %v433_v38 = vrot.slane %v432_v60, 1  ;;  %v443_v0 = vrot.slane %v442_v55, 4 }
 0x2bd   :  { %383 = vst.msk [vmem:[#allocation8] sm:$0xff] %vm126_vm8, %v381_v22  ;;  %v440_v7 = vrot.slane %v439_v2, 1 }
 0x2be   :  { %v451_v21 = vadd.f32 %v450_v9, %v449_v61  ;;  %v444_v1 = vadd.f32 %v443_v0, %v442_v55  ;;  %v434_v11 = vadd.f32 %v433_v38, %v432_v60 }
 0x2bf   :  { %v441_v17 = vadd.f32 %v440_v7, %v439_v2 }
 0x2c0   :  { %v452_v8 = vrot.slane %v451_v21, 2  ;;  %v445_v12 = vrot.slane %v444_v1, 2  ;;  %v475_v10 = vsel %vm117_vm4, %v434_v11, %v474_v19 }
 0x2c1   :  { %v476_v24 = vsel %vm119_vm5, %v441_v17, %v475_v10 }
 0x2c2   :  { %v453_v15 = vadd.f32 %v452_v8, %v451_v21  ;;  %v446_v16 = vadd.f32 %v445_v12, %v444_v1 }
 0x2c4   :  { %v454_v18 = vrot.slane %v453_v15, 1  ;;  %v447_v20 = vrot.slane %v446_v16, 1 }
 0x2c6   :  { %v455_v23 = vadd.f32 %v454_v18, %v453_v15  ;;  %v448_v4 = vadd.f32 %v447_v20, %v446_v16 }
 0x2c8   :  { %v477_v25 = vsel %vm121_vm6, %v448_v4, %v476_v24 }
 0x2c9   :  { %v478_v26 = vsel %vm123_vm7, %v455_v23, %v477_v25 }
 0x2ca   :  { %602 = vmatmul.msk.f32.vlgmr.msra.gmra.mxu0 %vm68_vm0, %v478_v26 }
 0x347   :  { %v498_v30 = vpop.f32.mrf.mxu0 }
 0x348   :  { %v499_v31 = vadd.f32 %v619_v29, %v498_v30 }
 0x34a   :  { %v603_v33 = vmul.f32 -1.442695, %v499_v31 }
 0x34c   :  { %639 = vpow2.f32 %v603_v33 }
 0x352   :  { %v640_v34 = vpop.eup %639 }
 0x353   :  { %v504_v35 = vadd.f32 1.0, %v640_v34 }
 0x355   :  { %641 = vrcp.f32 %v504_v35  ;;  %v516_v42 = vand.u32 2147483648, %v504_v35  ;;  %v514_v5 = vand.u32 2147483647, %v504_v35  ;;  %vm510_vm14 = vweird.f32 %v504_v35 }
 0x357   :  { %v517_v45 = vor.u32 1.1754944e-38, %v516_v42  ;;  %vm515_vm2 = vcmp.eq.f32.partialorder %v514_v5, 8.507059e+37 }
 0x35b   :  { %v642_v36 = vpop.eup %641 }
 0x35c   :  { %v506_v37 = vmul.f32 %v642_v36, %v504_v35  ;;  %vm511_vm13 = vweird.f32 %v642_v36 }
 0x35d   :  { %vm512_vm15 = vmor %vm510_vm14, %vm511_vm13 }
 0x35e   :  { %v507_v40 = vsub.f32 1.0, %v506_v37 }
 0x360   :  { %v508_v14 = vmul.f32 %v642_v36, %v507_v40 }
 0x362   :  { %v509_v43 = vadd.f32 %v642_v36, %v508_v14 }
 0x364   :  { %v513_v46 = vsel %vm512_vm15, %v642_v36, %v509_v43 }
 0x365   :  { %v518_v47 = vsel %vm515_vm2, %v517_v45, %v513_v46 }
 0x366   :  { %604 = vmatmul.msk.f32.vlgmr.msra.gmra.mxu1 %vm520_vm1, %v518_v47  ;;  %521 = vst.msk [vmem:[#allocation5] sm:$0xff] %vm520_vm1, %v518_v47 }
 0x367   :  { %564 = dma.vmem_to_hbm [thread:$0]  %s560_s11, 128, %s562_s30, [#allocation4]  }
 0x3e3   :  { %v548_v51 = vpop.f32.mrf.mxu1 }
 0x3e4   :  { %v549_v53 = vadd.f32 %v620_v49, %v548_v51 }
 0x3e6   :  { %v552_v54 = vmul.f32 %v549_v53, %v478_v26 }
 0x3e8   :  { %553 = vst.msk [vmem:[#allocation6] sm:$0xff] %vm68_vm0, %v552_v54 }
 0x3e9   :  { %575 = dma.vmem_to_hbm [thread:$0]  %s571_s15, 128, %s573_s0, [#allocation7]  }
 0x3ea   :  { %586 = dma.vmem_to_hbm [thread:$0]  %s582_s1, 128, %s584_s19, [#allocation7]  }
 0x3eb   :  { %741 = dma.done.wait [#allocation4], 128  }
 0x3ec   :  { %742 = vsyncadd [#allocation4], 4294967168 }
 0x3ed   :  { %743 = dma.done.wait [#allocation7], 256  }
 0x3ee   :  { %744 = vsyncadd [#allocation7], 4294967040 }
 0x3ef   :  { %599 = vsyncpa [#allocation3], 1 }
 0x3f0   :  { %600 = vsyncpa [#allocation4], 1 }
 0x3f1   :  { %601 = vsyncpa [#allocation7], 1 }

</bundles_post_ra>
